<compile_context>
chip_gen: v7x
topology: tpu7x:2x2x1
jax: 0.10.0
libtpu: 0.0.40
codegen_flags: <defaults>
</compile_context>

<pallas_src>
import jax
import jax.numpy as jnp
from jax.experimental import pallas as pl
from jax.experimental.pallas import tpu as pltpu

LANE = 128


def _round_up(n, m):
    return ((n + m - 1) // m) * m


def _cdiv(a, b):
    return -(-a // b)


def _pad_to(a, shape):
    pads = [(0, t - s) for s, t in zip(a.shape, shape)]
    if all(p == (0, 0) for p in pads):
        return a
    return jnp.pad(a, pads)


def mlp_kernel(x_ref, w1_ref, b1_ref, w2_ref, b2_ref, w3_ref, b3_ref, out_ref):
    # fc1 -> ReLU -> fc2 -> ReLU -> fc3, all in VMEM.
    # Matmuls run on the MXU in the weights' dtype (bf16 or f32) with f32 accumulation;
    # bias add / ReLU stay f32 on the VPU (v5e has no bf16 VPU/EUP).
    cdt = w1_ref.dtype  # MXU operand dtype
    x = x_ref[...]
    h1 = jnp.dot(x, w1_ref[...], preferred_element_type=jnp.float32) + b1_ref[...]
    h1 = jnp.maximum(h1, 0.0)
    h2 = jnp.dot(h1.astype(cdt), w2_ref[...], preferred_element_type=jnp.float32) + b2_ref[...]
    h2 = jnp.maximum(h2, 0.0)
    out = jnp.dot(h2.astype(cdt), w3_ref[...], preferred_element_type=jnp.float32) + b3_ref[...]
    out_ref[...] = out.astype(out_ref.dtype)


def nn_model_forward(
    x,
    params,
    *,
    mxu_dtype=jnp.bfloat16,
    batch_tile=512,
    gridless_max_batch=1024,
    min_grid_steps=8,
):
    """Forward of NN_model: relu(fc1) -> relu(fc2) -> fc3 (raw logits, no softmax).

    Only the output feature dims (H1, H2, D_out) are zero-padded to 128 lanes so every
    matmul output and the HBM store are lane-dense; contraction dims keep their native
    width (full-array block dims are legal). Zero padding is mathematically a no-op
    (zero weight cols/rows, zero bias, relu(0)=0) and is sliced off before returning.
    """
    w1, b1, w2, b2, w3, b3 = params
    B, D_in = x.shape
    H1, H2, D_out = w1.shape[1], w2.shape[1], w3.shape[1]

    # Lane-pad output feature dims only (review item 1): D_in stays un-padded.
    H1_p = _round_up(H1, LANE)
    H2_p = _round_up(H2, LANE)
    D_out_p = _round_up(D_out, LANE)

    # MXU operands (x + weights) in mxu_dtype; biases stay f32 for the VPU epilogue.
    x_c = x.astype(mxu_dtype)
    w1_c = _pad_to(w1, (D_in, H1_p)).astype(mxu_dtype)
    w2_c = _pad_to(w2, (H1_p, H2_p)).astype(mxu_dtype)
    w3_c = _pad_to(w3, (H2_p, D_out_p)).astype(mxu_dtype)
    b1_p = _pad_to(b1.reshape(1, -1).astype(jnp.float32), (1, H1_p))
    b2_p = _pad_to(b2.reshape(1, -1).astype(jnp.float32), (1, H2_p))
    b3_p = _pad_to(b3.reshape(1, -1).astype(jnp.float32), (1, D_out_p))

    if B <= gridless_max_batch:
        # Whole problem fits trivially in VMEM (B=1024 here is ~1 MiB of activations):
        # single gridless call, no per-step pipeline overhead, weights DMA'd exactly once.
        out_p = pl.pallas_call(
            mlp_kernel,
            out_shape=jax.ShapeDtypeStruct((B, D_out_p), jnp.float32),
        )(x_c, w1_c, b1_p, w2_c, b2_p, w3_c, b3_p)
        return out_p[:, :D_out]

    # Large batch: tile the batch dim. Pick the tile so the grid has at least
    # `min_grid_steps` steps (>= min_grid_steps/2 per TC on a 2-TC v7x chip, so
    # DMA/compute double-buffering actually overlaps), but never below 128 rows
    # (per-step overhead ~0.35 us) and never above `batch_tile` (512 ~ 85% of
    # HBM roofline on v6e).  Review items 3 & 4.
    tile = min(batch_tile, max(128, _round_up(_cdiv(B, min_grid_steps), 8)))
    B_p = _round_up(B, tile)
    # Single, batch-only pad of x (review item 2): no feature-dim pad at all.
    x_t = _pad_to(x_c, (B_p, D_in))
    grid = (B_p // tile,)

    out_p = pl.pallas_call(
        mlp_kernel,
        out_shape=jax.ShapeDtypeStruct((B_p, D_out_p), jnp.float32),
        grid_spec=pltpu.PrefetchScalarGridSpec(
            num_scalar_prefetch=0,
            grid=grid,
            in_specs=[
                # x: batch-tiled, native (un-padded) feature width.
                pl.BlockSpec((tile, D_in), lambda i: (i, 0)),
                # Weights / biases: constant index -> resident across all grid steps.
                pl.BlockSpec((D_in, H1_p), lambda i: (0, 0)),
                pl.BlockSpec((1, H1_p), lambda i: (0, 0)),
                pl.BlockSpec((H1_p, H2_p), lambda i: (0, 0)),
                pl.BlockSpec((1, H2_p), lambda i: (0, 0)),
                pl.BlockSpec((H2_p, D_out_p), lambda i: (0, 0)),
                pl.BlockSpec((1, D_out_p), lambda i: (0, 0)),
            ],
            out_specs=pl.BlockSpec((tile, D_out_p), lambda i: (i, 0)),
        ),
        compiler_params=pltpu.CompilerParams(
            # Batch axis is independent -> megacore-shardable on v7x.
            dimension_semantics=("parallel",),
        ),
    )(x_t, w1_c, b1_p, w2_c, b2_p, w3_c, b3_p)
    return out_p[:B, :D_out]


def init_linear(key, fan_in, fan_out):
    # Mimics torch.nn.Linear default init: U(-1/sqrt(fan_in), 1/sqrt(fan_in)).
    kw, kb = jax.random.split(key)
    bound = 1.0 / jnp.sqrt(fan_in)
    w = jax.random.uniform(kw, (fan_in, fan_out), jnp.float32, -bound, bound)
    b = jax.random.uniform(kb, (1, fan_out), jnp.float32, -bound, bound)
    return w, b


def reference_forward(x, params):
    w1, b1, w2, b2, w3, b3 = params
    h = jnp.maximum(x @ w1 + b1, 0.0)
    h = jnp.maximum(h @ w2 + b2, 0.0)
    return h @ w3 + b3


if __name__ == "__main__":
    # Shapes consistent with NN_model(input_size, hidden_sizes, output_size, batch_size).
    batch_size = 16
    input_size = 64
    hidden_sizes = (128, 64)
    output_size = 10

    key = jax.random.PRNGKey(0)
    kx, k1, k2, k3, kxb, kxo = jax.random.split(key, 6)

    x = jax.random.normal(kx, (batch_size, input_size), jnp.float32)
    w1, b1 = init_linear(k1, input_size, hidden_sizes[0])
    w2, b2 = init_linear(k2, hidden_sizes[0], hidden_sizes[1])
    w3, b3 = init_linear(k3, hidden_sizes[1], output_size)
    params = (w1, b1, w2, b2, w3, b3)

    # --- Small batch: gridless single-block path ---
    ref = reference_forward(x, params)
    # f32 MXU operands: bit-comparable to the f32 reference.
    out_f32 = jax.block_until_ready(nn_model_forward(x, params, mxu_dtype=jnp.float32))
    assert out_f32.shape == (batch_size, output_size)
    assert jnp.allclose(out_f32, ref, atol=1e-4, rtol=1e-4), "mismatch (gridless, f32)"
    # Default bf16 MXU operands (f32 accumulate): relaxed tolerance.
    out_bf16 = jax.block_until_ready(nn_model_forward(x, params))
    assert jnp.allclose(out_bf16, ref, atol=5e-2, rtol=5e-2), "mismatch (gridless, bf16)"

    # --- Large batch: batch-tiled parallel grid path ---
    big_batch = 2048  # > gridless_max_batch -> tile=256, grid=8 (>=4 steps per TC)
    xb = jax.random.normal(kxb, (big_batch, input_size), jnp.float32)
    ref_b = reference_forward(xb, params)
    out_b_f32 = jax.block_until_ready(nn_model_forward(xb, params, mxu_dtype=jnp.float32))
    assert out_b_f32.shape == (big_batch, output_size)
    assert jnp.allclose(out_b_f32, ref_b, atol=1e-4, rtol=1e-4), "mismatch (tiled, f32)"
    out_b_bf16 = jax.block_until_ready(nn_model_forward(xb, params))
    assert jnp.allclose(out_b_bf16, ref_b, atol=5e-2, rtol=5e-2), "mismatch (tiled, bf16)"

    # --- Odd batch size: exercises batch padding + slice on the tiled path ---
    odd_batch = 1100  # tile=144, B_p=1152, grid=8; 52 padded rows sliced off
    xo = jax.random.normal(kxo, (odd_batch, input_size), jnp.float32)
    ref_o = reference_forward(xo, params)
    out_o = jax.block_until_ready(nn_model_forward(xo, params, mxu_dtype=jnp.float32))
    assert out_o.shape == (odd_batch, output_size)
    assert jnp.allclose(out_o, ref_o, atol=1e-4, rtol=1e-4), "mismatch (tiled, odd batch)"

    print("KERNEL_OK")
</pallas_src>

<mosaic_0001>
module attributes {stable_mosaic.version = 11 : i64} {
  func.func @mlp_kernel(%arg0: memref<16x64xf32, #tpu.memory_space<vmem>>, %arg1: memref<64x128xf32, #tpu.memory_space<vmem>>, %arg2: memref<1x128xf32, #tpu.memory_space<vmem>>, %arg3: memref<128x128xf32, #tpu.memory_space<vmem>>, %arg4: memref<1x128xf32, #tpu.memory_space<vmem>>, %arg5: memref<128x128xf32, #tpu.memory_space<vmem>>, %arg6: memref<1x128xf32, #tpu.memory_space<vmem>>, %arg7: memref<16x128xf32, #tpu.memory_space<vmem>>) attributes {dimension_semantics = [], scalar_prefetch = 0 : i64, scratch_operands = 0 : i64, tpu.core_type = #tpu.core_type<tc>} {
    %c0 = arith.constant 0 : index
    %c0_0 = arith.constant 0 : index
    %0 = vector.load %arg0[%c0, %c0_0] : memref<16x64xf32, #tpu.memory_space<vmem>>, vector<16x64xf32>
    %c0_1 = arith.constant 0 : index
    %c0_2 = arith.constant 0 : index
    %1 = vector.load %arg1[%c0_1, %c0_2] : memref<64x128xf32, #tpu.memory_space<vmem>>, vector<64x128xf32>
    %cst = arith.constant dense<0.000000e+00> : vector<16x128xf32>
    %2 = tpu.matmul %0, %1, %cst {dimension_numbers = #tpu.dot_dimension_numbers<[1], [0], [0], [1], [0, 0, 1, 1], [], []>} : vector<16x64xf32>, vector<64x128xf32>, vector<16x128xf32> -> vector<16x128xf32>
    %c0_3 = arith.constant 0 : index
    %c0_4 = arith.constant 0 : index
    %3 = vector.load %arg2[%c0_3, %c0_4] : memref<1x128xf32, #tpu.memory_space<vmem>>, vector<1x128xf32>
    %4 = vector.broadcast %3 : vector<1x128xf32> to vector<16x128xf32>
    %5 = arith.addf %2, %4 : vector<16x128xf32>
    %cst_5 = arith.constant 0.000000e+00 : f32
    %6 = vector.broadcast %cst_5 : f32 to vector<16x128xf32>
    %7 = arith.maximumf %5, %6 : vector<16x128xf32>
    %c0_6 = arith.constant 0 : index
    %c0_7 = arith.constant 0 : index
    %8 = vector.load %arg3[%c0_6, %c0_7] : memref<128x128xf32, #tpu.memory_space<vmem>>, vector<128x128xf32>
    %cst_8 = arith.constant dense<0.000000e+00> : vector<16x128xf32>
    %9 = tpu.matmul %7, %8, %cst_8 {dimension_numbers = #tpu.dot_dimension_numbers<[1], [0], [0], [1], [0, 0, 1, 1], [], []>} : vector<16x128xf32>, vector<128x128xf32>, vector<16x128xf32> -> vector<16x128xf32>
    %c0_9 = arith.constant 0 : index
    %c0_10 = arith.constant 0 : index
    %10 = vector.load %arg4[%c0_9, %c0_10] : memref<1x128xf32, #tpu.memory_space<vmem>>, vector<1x128xf32>
    %11 = vector.broadcast %10 : vector<1x128xf32> to vector<16x128xf32>
    %12 = arith.addf %9, %11 : vector<16x128xf32>
    %cst_11 = arith.constant 0.000000e+00 : f32
    %13 = vector.broadcast %cst_11 : f32 to vector<16x128xf32>
    %14 = arith.maximumf %12, %13 : vector<16x128xf32>
    %c0_12 = arith.constant 0 : index
    %c0_13 = arith.constant 0 : index
    %15 = vector.load %arg5[%c0_12, %c0_13] : memref<128x128xf32, #tpu.memory_space<vmem>>, vector<128x128xf32>
    %cst_14 = arith.constant dense<0.000000e+00> : vector<16x128xf32>
    %16 = tpu.matmul %14, %15, %cst_14 {dimension_numbers = #tpu.dot_dimension_numbers<[1], [0], [0], [1], [0, 0, 1, 1], [], []>} : vector<16x128xf32>, vector<128x128xf32>, vector<16x128xf32> -> vector<16x128xf32>
    %c0_15 = arith.constant 0 : index
    %c0_16 = arith.constant 0 : index
    %17 = vector.load %arg6[%c0_15, %c0_16] : memref<1x128xf32, #tpu.memory_space<vmem>>, vector<1x128xf32>
    %18 = vector.broadcast %17 : vector<1x128xf32> to vector<16x128xf32>
    %19 = arith.addf %16, %18 : vector<16x128xf32>
    %c0_17 = arith.constant 0 : index
    %c0_18 = arith.constant 0 : index
    %20 = vector.load %arg7[%c0_17, %c0_18] : memref<16x128xf32, #tpu.memory_space<vmem>>, vector<16x128xf32>
    tpu.vector_store %arg7[%c0_17, %c0_18], %19 {strides = array<i32>} : memref<16x128xf32, #tpu.memory_space<vmem>>, vector<16x128xf32>,
    return
  }
}

</mosaic_0001>

<bundles_post_ra>
// kernel: tpu_custom_call.1
= control target key start
LH: loop header
LB: loop body
LE: loop exit
PB: predicated region body
PF: predicated region fallthrough
CT: control target
= control target key end

     0   :  { %12 = vsyncpa [#allocation3], 0  ;;  %s894_s0 = inlined_call_operand.hbm [shape: f32[16,64], index: 0, kind: input, shape index: {}]   ;;  %s895_s1 = inlined_call_operand.hbm [shape: f32[64,128], index: 1, kind: input, shape index: {}]   ;;  %s896_s2 = inlined_call_operand.vmem [shape: f32[1,128], index: 2, kind: input, shape index: {}]   ;;  %s897_s3 = inlined_call_operand.hbm [shape: f32[128,128], index: 3, kind: input, shape index: {}]   ;;  %s898_s4 = inlined_call_operand.vmem [shape: f32[1,128], index: 4, kind: input, shape index: {}]   ;;  %s899_s5 = inlined_call_operand.hbm [shape: f32[128,128], index: 5, kind: input, shape index: {}]   ;;  %s900_s6 = inlined_call_operand.vmem [shape: f32[1,128], index: 6, kind: input, shape index: {}]   ;;  %s901_s7 = inlined_call_operand.hbm [shape: f32[16,128], index: 7, kind: output, shape index: {}]  }
   0x1   :  { %13 = vsyncpa [#allocation6], 0 }
   0x2   :  { %14 = vsyncpa [#allocation9], 0 }
   0x3   :  { %15 = vsyncpa [#allocation4], 0  ;;  %s747_s24 = smov [#allocation5]   ;;  %s748_s26 = smov [#allocation2]  }
   0x4   :  { %s33_s25 = sshll.u32 %s747_s24, 4  ;;  %s21_s27 = sshll.u32 %s748_s26, 4  ;;  %s34_s25 = int_to_ptr.vmem [resolvable:$true] %s33_s25  ;;  %s794_s27 = int_to_ptr.vmem [resolvable:$true] %s21_s27 }
   0x5   :  { %s629_s30 = scalar_lea.hbm %s895_s1, 1024 }
   0x6   :  { %p630_p0 = scmp.ne.s32.totalorder %s895_s1, %s629_s30  ;;  %p633_p1 = scmp.lt.u32.totalorder %s629_s30, %s895_s1 }
   0x8   :  { %p635_p2 = pnand %p633_p1, %p630_p0 }
   0xa   :  { %638 = shalt.err (!%p635_p2)
}
   0xb   :  { %s639_s12 = scalar_lea.vmem %s34_s25, 1024  ;;  %p644_p4 = scmp.lt.s32.totalorder %s34_s25, %s34_s25 }
   0xc   :  { %p640_p3 = scmp.ne.s32.totalorder %s34_s25, %s639_s12  ;;  %p645_p5 = scmp.lt.s32.totalorder %s639_s12, %s639_s12 }
   0xe   :  { %p646_p6 = por %p645_p5, %p644_p4 }
  0x10   :  { %p647_p7 = pnand %p646_p6, %p640_p3 }
  0x12   :  { %650 = shalt.err (!%p647_p7)
}
  0x13   :  { %s749_s13 = smov 128   ;;  %s750_s14 = smov 8  }
  0x14   :  { %39 = dma.hbm_to_vmem [thread:$0]  %s895_s1, 1024, %s34_s25, [#allocation6], %s749_s13, %s749_s13, %s750_s14  }
  0x15   :  { %s651_s19 = scalar_lea.hbm %s894_s0, 256 }
  0x16   :  { %p652_p8 = scmp.ne.s32.totalorder %s894_s0, %s651_s19  ;;  %p655_p9 = scmp.lt.u32.totalorder %s651_s19, %s894_s0 }
  0x18   :  { %p657_p10 = pnand %p655_p9, %p652_p8 }
  0x1a   :  { %660 = shalt.err (!%p657_p10)
}
  0x1b   :  { %s661_s24 = scalar_lea.vmem %s794_s27, 256  ;;  %p666_p12 = scmp.lt.s32.totalorder %s794_s27, %s794_s27 }
  0x1c   :  { %p662_p11 = scmp.ne.s32.totalorder %s794_s27, %s661_s24  ;;  %p667_p13 = scmp.lt.s32.totalorder %s661_s24, %s661_s24 }
  0x1e   :  { %p668_p0 = por %p667_p13, %p666_p12 }
  0x20   :  { %p669_p1 = pnand %p668_p0, %p662_p11 }
  0x22   :  { %672 = shalt.err (!%p669_p1)
}
  0x23   :  { %27 = dma.hbm_to_vmem [thread:$0]  %s894_s0, 256, %s794_s27, [#allocation3], %s749_s13, %s749_s13, %s750_s14  }
  0x24   :  { %s751_s26 = smov [#allocation7]   ;;  %s752_s29 = smov [#allocation8]  }
  0x25   :  { %s47_s28 = sshll.u32 %s751_s26, 4  ;;  %s61_s30 = sshll.u32 %s752_s29, 4  ;;  %s48_s28 = int_to_ptr.vmem [resolvable:$true] %s47_s28  ;;  %s831_s30 = int_to_ptr.vmem [resolvable:$true] %s61_s30 }
  0x26   :  { %s673_s10 = scalar_lea.hbm %s897_s3, 2048 }
  0x27   :  { %p674_p2 = scmp.ne.s32.totalorder %s897_s3, %s673_s10  ;;  %p677_p3 = scmp.lt.u32.totalorder %s673_s10, %s897_s3 }
  0x29   :  { %p679_p4 = pnand %p677_p3, %p674_p2 }
  0x2b   :  { %682 = shalt.err (!%p679_p4)
}
  0x2c   :  { %s683_s0 = scalar_lea.vmem %s48_s28, 2048  ;;  %p688_p6 = scmp.lt.s32.totalorder %s48_s28, %s48_s28 }
  0x2d   :  { %p684_p5 = scmp.ne.s32.totalorder %s48_s28, %s683_s0  ;;  %p689_p7 = scmp.lt.s32.totalorder %s683_s0, %s683_s0 }
  0x2f   :  { %p690_p8 = por %p689_p7, %p688_p6 }
  0x31   :  { %p691_p9 = pnand %p690_p8, %p684_p5 }
  0x33   :  { %694 = shalt.err (!%p691_p9)
}
  0x34   :  { %53 = dma.hbm_to_vmem [thread:$0]  %s897_s3, 2048, %s48_s28, [#allocation6], %s749_s13, %s749_s13, %s750_s14  }
  0x35   :  { %s695_s20 = scalar_lea.hbm %s899_s5, 2048 }
  0x36   :  { %p696_p10 = scmp.ne.s32.totalorder %s899_s5, %s695_s20  ;;  %p699_p11 = scmp.lt.u32.totalorder %s695_s20, %s899_s5 }
  0x38   :  { %p701_p12 = pnand %p699_p11, %p696_p10 }
  0x3a   :  { %704 = shalt.err (!%p701_p12)
}
  0x3b   :  { %s705_s1 = scalar_lea.vmem %s831_s30, 2048  ;;  %p710_p0 = scmp.lt.s32.totalorder %s831_s30, %s831_s30 }
  0x3c   :  { %p706_p13 = scmp.ne.s32.totalorder %s831_s30, %s705_s1  ;;  %p711_p1 = scmp.lt.s32.totalorder %s705_s1, %s705_s1 }
  0x3e   :  { %p712_p2 = por %p711_p1, %p710_p0 }
  0x40   :  { %p713_p3 = pnand %p712_p2, %p706_p13 }
  0x42   :  { %716 = shalt.err (!%p713_p3)
}
  0x43   :  { %67 = dma.hbm_to_vmem [thread:$0]  %s899_s5, 2048, %s831_s30, [#allocation9], %s749_s13, %s749_s13, %s750_s14  }
  0x44   :  { %739 = dma.done.wait [#allocation3], 256  }
  0x45   :  { %740 = vsyncadd [#allocation3], 4294967040 }
  0x46   :  { %741 = dma.done.wait [#allocation6], 3072  }
  0x47   :  { %742 = vsyncadd [#allocation6], 4294964224 }
  0x48   :  { %743 = dma.done.wait [#allocation9], 2048  }
  0x49   :  { %744 = vsyncadd [#allocation9], 4294965248  ;;  %v84_v0 = vld [vmem:[#allocation5] sm:$0xff]  ;;  %v85_v1 = vld [vmem:[#allocation5 + $0x8] sm:$0xff]  ;;  %vm99_vm0 = vcmask 523264   ;;  %s753_s8 = smov [#allocation10]  }
  0x4a   :  { %v86_v2 = vld [vmem:[#allocation5 + $0x10] sm:$0xff]  ;;  %v542_v3 = vpack.c.bf16 %v85_v1, %v84_v0  ;;  %v87_v4 = vld [vmem:[#allocation5 + $0x18] sm:$0xff]  ;;  %v88_v6 = vld [vmem:[#allocation5 + $0x20] sm:$0xff]  ;;  %s388_s9 = sshll.u32 %s753_s8, 4  ;;  %s389_s9 = int_to_ptr.vmem [resolvable:$true] %s388_s9 }
  0x4b   :  { %v546_v5 = vpack.c.bf16 %v87_v4, %v86_v2  ;;  %v89_v7 = vld [vmem:[#allocation5 + $0x28] sm:$0xff]  ;;  %v82_v8 = vld [vmem:[#allocation2] sm:$0xff]  ;;  %v183_v9 = vld [vmem:[#allocation7] sm:$0xff]  ;;  %p722_p5 = scmp.lt.s32.totalorder %s389_s9, %s389_s9 }
  0x4c   :  { %543 = vmatprep.subr.bf16.mxu0 %v542_v3  ;;  %469 = vmatprep.mubr.msk.f32.mxu0 %vm99_vm0, %v82_v8  ;;  %v184_v10 = vld [vmem:[#allocation7 + $0x8] sm:$0xff]  ;;  %v185_v12 = vld [vmem:[#allocation7 + $0x10] sm:$0xff]  ;;  %v186_v13 = vld [vmem:[#allocation7 + $0x18] sm:$0xff]  ;;  %v550_v14 = vpack.c.bf16 %v89_v7, %v88_v6 }
  0x4d   :  { %545 = vmatpush3.bf16.msra.mxu0 %v542_v3  ;;  %v558_v11 = vpack.c.bf16 %v184_v10, %v183_v9  ;;  %v562_v15 = vpack.c.bf16 %v186_v13, %v185_v12  ;;  %v187_v16 = vld [vmem:[#allocation7 + $0x20] sm:$0xff]  ;;  %v188_v17 = vld [vmem:[#allocation7 + $0x28] sm:$0xff]  ;;  %v90_v18 = vld [vmem:[#allocation5 + $0x30] sm:$0xff] }
  0x4e   :  { %547 = vmatprep.subr.bf16.mxu0 %v546_v5  ;;  %v91_v19 = vld [vmem:[#allocation5 + $0x38] sm:$0xff]  ;;  %v566_v20 = vpack.c.bf16 %v188_v17, %v187_v16  ;;  %v189_v22 = vld [vmem:[#allocation7 + $0x30] sm:$0xff]  ;;  %v191_v25 = vld [vmem:[#allocation7 + $0x40] sm:$0xff] }
  0x4f   :  { %559 = vmatprep.subr.bf16.mxu1 %v558_v11  ;;  %v554_v21 = vpack.c.bf16 %v91_v19, %v90_v18  ;;  %v190_v23 = vld [vmem:[#allocation7 + $0x38] sm:$0xff]  ;;  %v192_v26 = vld [vmem:[#allocation7 + $0x48] sm:$0xff]  ;;  %v193_v29 = vld [vmem:[#allocation7 + $0x50] sm:$0xff] }
  0x50   :  { %561 = vmatpush3.bf16.msra.mxu1 %v558_v11  ;;  %v570_v24 = vpack.c.bf16 %v190_v23, %v189_v22  ;;  %v83_v27 = vld [vmem:[#allocation2 + $0x8] sm:$0xff]  ;;  %v574_v28 = vpack.c.bf16 %v192_v26, %v191_v25  ;;  %v195_v32 = vld [vmem:[#allocation7 + $0x60] sm:$0xff]  ;;  %v196_v33 = vld [vmem:[#allocation7 + $0x68] sm:$0xff] }
  0x51   :  { %549 = vmatpush3.bf16.msra.mxu0 %v546_v5  ;;  %563 = vmatprep.subr.bf16.mxu1 %v562_v15  ;;  %v194_v30 = vld [vmem:[#allocation7 + $0x58] sm:$0xff]  ;;  %v582_v34 = vpack.c.bf16 %v196_v33, %v195_v32  ;;  %v197_v35 = vld [vmem:[#allocation7 + $0x70] sm:$0xff]  ;;  %v283_v38 = vld [vmem:[#allocation8] sm:$0xff] }
  0x52   :  { %551 = vmatprep.subr.bf16.mxu0 %v550_v14  ;;  %v578_v31 = vpack.c.bf16 %v194_v30, %v193_v29  ;;  %v198_v36 = vld [vmem:[#allocation7 + $0x78] sm:$0xff]  ;;  %v284_v39 = vld [vmem:[#allocation8 + $0x8] sm:$0xff]  ;;  %v285_v40 = vld [vmem:[#allocation8 + $0x10] sm:$0xff] }
  0x53   :  { %v586_v37 = vpack.c.bf16 %v198_v36, %v197_v35  ;;  %v590_v41 = vpack.c.bf16 %v284_v39, %v283_v38  ;;  %v286_v42 = vld [vmem:[#allocation8 + $0x18] sm:$0xff]  ;;  %v287_v44 = vld [vmem:[#allocation8 + $0x20] sm:$0xff]  ;;  %v288_v45 = vld [vmem:[#allocation8 + $0x28] sm:$0xff] }
  0x54   :  { %565 = vmatpush3.bf16.msra.mxu1 %v562_v15  ;;  %v594_v43 = vpack.c.bf16 %v286_v42, %v285_v40  ;;  %v598_v46 = vpack.c.bf16 %v288_v45, %v287_v44  ;;  %v289_v47 = vld [vmem:[#allocation8 + $0x30] sm:$0xff]  ;;  %v290_v48 = vld [vmem:[#allocation8 + $0x38] sm:$0xff]  ;;  %v291_v50 = vld [vmem:[#allocation8 + $0x40] sm:$0xff] }
  0x55   :  { %553 = vmatpush3.bf16.msra.mxu0 %v550_v14  ;;  %567 = vmatprep.subr.bf16.mxu1 %v566_v20  ;;  %v602_v49 = vpack.c.bf16 %v290_v48, %v289_v47  ;;  %v292_v51 = vld [vmem:[#allocation8 + $0x48] sm:$0xff]  ;;  %v293_v53 = vld [vmem:[#allocation8 + $0x50] sm:$0xff]  ;;  %v294_v54 = vld [vmem:[#allocation8 + $0x58] sm:$0xff] }
  0x56   :  { %555 = vmatprep.subr.bf16.mxu0 %v554_v21  ;;  %v606_v52 = vpack.c.bf16 %v292_v51, %v291_v50  ;;  %v610_v55 = vpack.c.bf16 %v294_v54, %v293_v53  ;;  %v295_v56 = vld [vmem:[#allocation8 + $0x60] sm:$0xff]  ;;  %v296_v57 = vld [vmem:[#allocation8 + $0x68] sm:$0xff]  ;;  %v402_v59 = vld [vmem:[%s896_s2] ss:$0 sm:$0xff] }
  0x57   :  { %v614_v58 = vpack.c.bf16 %v296_v57, %v295_v56  ;;  %v297_v2 = vld [vmem:[#allocation8 + $0x70] sm:$0xff]  ;;  %v298_v3 = vld [vmem:[#allocation8 + $0x78] sm:$0xff] }
  0x58   :  { %569 = vmatpush3.bf16.msra.mxu1 %v566_v20  ;;  %v618_v4 = vpack.c.bf16 %v298_v3, %v297_v2  ;;  %v405_v5 = vld [vmem:[%s898_s4] ss:$0 sm:$0xff]  ;;  %s717_s4 = scalar_lea.vmem %s389_s9, 256 }
  0x59   :  { %557 = vmatpush3.bf16.msra.mxu0 %v554_v21  ;;  %571 = vmatprep.subr.bf16.mxu1 %v570_v24  ;;  %v406_v12 = vld [vmem:[%s900_s6] ss:$0 sm:$0xff]  ;;  %p718_p4 = scmp.ne.s32.totalorder %s389_s9, %s717_s4  ;;  %p723_p6 = scmp.lt.s32.totalorder %s717_s4, %s717_s4 }
  0x5a   :  { %591 = vmatprep.subr.bf16.mxu0 %v590_v41 }
  0x5b   :  { %p724_p7 = por %p723_p6, %p722_p5 }
  0x5c   :  { %470 = vmatmul.mubr.msk.f32.vlgmr.msra.gmra.mrb[0].mxu0 %vm99_vm0, %v83_v27  ;;  %573 = vmatpush3.bf16.msra.mxu1 %v570_v24 }
  0x5d   :  { %575 = vmatprep.subr.bf16.mxu1 %v574_v28  ;;  %593 = vmatpush3.bf16.msra.mxu0 %v590_v41  ;;  %p725_p8 = pnand %p724_p7, %p718_p4 }
  0x5e   :  { %595 = vmatprep.subr.bf16.mxu0 %v594_v43 }
  0x60   :  { %577 = vmatpush3.bf16.msra.mxu1 %v574_v28 }
  0x61   :  { %579 = vmatprep.subr.bf16.mxu1 %v578_v31  ;;  %597 = vmatpush3.bf16.msra.mxu0 %v594_v43 }
  0x62   :  { %599 = vmatprep.subr.bf16.mxu0 %v598_v46 }
  0x64   :  { %581 = vmatpush3.bf16.msra.mxu1 %v578_v31 }
  0x65   :  { %583 = vmatprep.subr.bf16.mxu1 %v582_v34  ;;  %601 = vmatpush3.bf16.msra.mxu0 %v598_v46 }
  0x66   :  { %603 = vmatprep.subr.bf16.mxu0 %v602_v49 }
  0x68   :  { %585 = vmatpush3.bf16.msra.mxu1 %v582_v34 }
  0x69   :  { %587 = vmatprep.subr.bf16.mxu1 %v586_v37  ;;  %605 = vmatpush3.bf16.msra.mxu0 %v602_v49 }
  0x6a   :  { %607 = vmatprep.subr.bf16.mxu0 %v606_v52 }
  0x6c   :  { %589 = vmatpush3.bf16.msra.mxu1 %v586_v37 }
  0x6d   :  { %609 = vmatpush3.bf16.msra.mxu0 %v606_v52 }
  0x6e   :  { %611 = vmatprep.subr.bf16.mxu0 %v610_v55 }
  0x71   :  { %613 = vmatpush3.bf16.msra.mxu0 %v610_v55 }
  0x72   :  { %615 = vmatprep.subr.bf16.mxu0 %v614_v58 }
  0x75   :  { %617 = vmatpush3.bf16.msra.mxu0 %v614_v58 }
  0x76   :  { %619 = vmatprep.subr.bf16.mxu0 %v618_v4 }
  0x79   :  { %621 = vmatpush3.bf16.msra.mxu0 %v618_v4 }
 0x12f   :  { %v471_v60 = vpop.f32.mrb[0].mxu0 }
 0x130   :  { %v178_v61 = vadd.f32 %v471_v60, %v402_v59  ;;  %v172_v62 = vpop.f32.mrb[1].mxu0 }
 0x131   :  { %v173_v63 = vadd.f32 %v402_v59, %v172_v62 }
 0x132   :  { %v182_v1 = vmax.f32 %v178_v61, 0.0 }
 0x133   :  { %v181_v0 = vmax.f32 %v173_v63, 0.0 }
 0x135   :  { %504 = vmatprep.mubr.f32.mxu1 %v181_v0 }
 0x136   :  { %505 = vmatmul.mubr.f32.vlgmr.msra.gmra.mrb[0].mxu1 %v182_v1 }
 0x209   :  { %v506_v6 = vpop.f32.mrb[0].mxu1 }
 0x20a   :  { %v278_v7 = vadd.f32 %v506_v6, %v405_v5  ;;  %v272_v8 = vpop.f32.mrb[1].mxu1 }
 0x20b   :  { %v273_v9 = vadd.f32 %v405_v5, %v272_v8 }
 0x20c   :  { %v282_v11 = vmax.f32 %v278_v7, 0.0 }
 0x20d   :  { %v281_v10 = vmax.f32 %v273_v9, 0.0 }
 0x20f   :  { %539 = vmatprep.mubr.f32.mxu0 %v281_v10 }
 0x210   :  { %540 = vmatmul.mubr.f32.vlgmr.msra.gmra.mrb[2].mxu0 %v282_v11 }
 0x2e3   :  { %v541_v13 = vpop.f32.mrb[2].mxu0 }
 0x2e4   :  { %v378_v14 = vadd.f32 %v541_v13, %v406_v12  ;;  %v372_v15 = vpop.f32.mrb[3].mxu0 }
 0x2e5   :  { %v373_v16 = vadd.f32 %v406_v12, %v372_v15 }
 0x2e6   :  { %382 = vst [vmem:[#allocation10 + $0x8] sm:$0xff] %v378_v14 }
 0x2e7   :  { %381 = vst [vmem:[#allocation10] sm:$0xff] %v373_v16 }
 0x2e8   :  { %728 = shalt.err (!%p725_p8)
}
 0x2e9   :  { %s729_s6 = scalar_lea.hbm %s901_s7, 256 }
 0x2ea   :  { %p730_p9 = scmp.ne.s32.totalorder %s901_s7, %s729_s6  ;;  %p733_p10 = scmp.lt.u32.totalorder %s729_s6, %s901_s7 }
 0x2ec   :  { %p735_p11 = pnand %p733_p10, %p730_p9 }
 0x2ee   :  { %738 = shalt.err (!%p735_p11)
}
 0x2ef   :  { %394 = dma.vmem_to_hbm [thread:$0]  %s389_s9, 256, %s901_s7, [#allocation4], %s749_s13, %s749_s13, %s750_s14  }
 0x2f0   :  { %745 = dma.done.wait [#allocation4], 256  }
 0x2f1   :  { %746 = vsyncadd [#allocation4], 4294967040 }
 0x2f2   :  { %398 = vsyncpa [#allocation3], 1 }
 0x2f3   :  { %399 = vsyncpa [#allocation6], 1 }
 0x2f4   :  { %400 = vsyncpa [#allocation9], 1 }
 0x2f5   :  { %401 = vsyncpa [#allocation4], 1 }

</bundles_post_ra>
